<compile_context>
chip_gen: v7x
topology: tpu7x:2x2x1
jax: 0.10.0
libtpu: 0.0.40
codegen_flags: <defaults>
</compile_context>

<pallas_src>
import jax
import jax.numpy as jnp
from jax.experimental import pallas as pl
from jax.experimental.pallas import tpu as pltpu


def _device_kind():
    try:
        return jax.devices()[0].device_kind.lower()
    except Exception:
        return ""


def _streaming_config():
    """(per-input block target bytes, vmem_limit_bytes), sized per generation."""
    kind = _device_kind()
    if "v7" in kind or "7x" in kind:
        # 64 MiB physical VMEM / TC: large tiles, but keep the limit well < 64.
        return 8 << 20, 48 << 20
    if "v6" in kind:
        # 128 MiB physical, 32 MiB default scoped limit: lots of headroom.
        return 8 << 20, 80 << 20
    if "v5" in kind:
        # 128 MiB physical but only a 16 MiB default scoped limit -> raise it.
        return 6 << 20, 64 << 20
    # Unknown chip / interpret mode: conservative.
    return 4 << 20, 48 << 20


def _choose_row_tile(n_rows, hidden, itemsize, target_bytes):
    """Rows per streaming tile.

    Budget: 2 inputs x 2 double-buffers x (tn * hidden * itemsize) activation
    bytes plus the lane-padded (tn, 1) score buffers (tn * 512 B each) must sit
    comfortably under vmem_limit_bytes; the row cap of 4096 bounds the latter.
    """
    raw = max(1, target_bytes // max(1, hidden * itemsize))
    if raw >= 256:
        tn = min(4096, (raw // 256) * 256)   # lane- and bf16-packing friendly
    else:
        tn = max(8, (raw // 8) * 8)          # fallback for very large hidden
    if n_rows <= tn:
        return n_rows                        # single block (full-dim -> always legal)
    return tn


def _phi_pair_kernel(w_ref, bias_ref, a_ref, b_ref, oa_ref, ob_ref):
    # w_ref:   (1, H)   linear weight, lane-dense, resident in VMEM
    # bias_ref:(1, 1)   scalar bias in SMEM
    # a_ref/b_ref:   (TN, H) row tiles of sentence A / B
    # oa_ref/ob_ref: (TN, 1) scores
    w = w_ref[...].astype(jnp.float32)           # (1, H)
    bias = bias_ref[0, 0]                        # scalar read from SMEM

    a = a_ref[...].astype(jnp.float32)           # f32 accumulate (v5e has no bf16 VPU)
    b = b_ref[...].astype(jnp.float32)

    # VPU multiply + XLU lane reduction; equivalent to x @ w.T + bias.
    oa_ref[...] = (jnp.sum(a * w, axis=-1, keepdims=True) + bias).astype(oa_ref.dtype)
    ob_ref[...] = (jnp.sum(b * w, axis=-1, keepdims=True) + bias).astype(ob_ref.dtype)


def _phi_pair(a_flat, b_flat, weight_1h, bias_2d):
    """a_flat/b_flat: (N, H); weight_1h: (1, H) f32; bias_2d: (1, 1) f32.

    Returns (score_a, score_b), each (N, 1) float32."""
    n, h = a_flat.shape
    itemsize = jnp.dtype(a_flat.dtype).itemsize
    target_bytes, vmem_limit = _streaming_config()
    tn = _choose_row_tile(n, h, itemsize, target_bytes)

    # Ragged last block is handled by Pallas (padded reads, clipped writes);
    # no jnp.pad HBM copy of the activations.
    grid = (pl.cdiv(n, tn),)

    cost = pl.CostEstimate(
        flops=4 * n * h,                                   # mul+add, two sentences
        transcendentals=0,
        bytes_accessed=2 * n * h * itemsize + 2 * n * 4 + h * 4 + 4,
    )

    score_a, score_b = pl.pallas_call(
        _phi_pair_kernel,
        out_shape=(
            jax.ShapeDtypeStruct((n, 1), jnp.float32),
            jax.ShapeDtypeStruct((n, 1), jnp.float32),
        ),
        grid_spec=pltpu.PrefetchScalarGridSpec(
            num_scalar_prefetch=0,
            grid=grid,
            in_specs=[
                pl.BlockSpec((1, h), lambda i: (0, 0)),                  # weight (resident)
                pl.BlockSpec(memory_space=pltpu.MemorySpace.SMEM),       # bias scalar
                pl.BlockSpec((tn, h), lambda i: (i, 0)),                 # sentence A rows
                pl.BlockSpec((tn, h), lambda i: (i, 0)),                 # sentence B rows
            ],
            out_specs=[
                pl.BlockSpec((tn, 1), lambda i: (i, 0)),
                pl.BlockSpec((tn, 1), lambda i: (i, 0)),
            ],
        ),
        compiler_params=pltpu.CompilerParams(
            dimension_semantics=("parallel",),   # shards row tiles across TCs where available
            vmem_limit_bytes=vmem_limit,         # explicit: v5e's 16 MiB default is too small
        ),
        cost_estimate=cost,
    )(weight_1h, bias_2d, a_flat, b_flat)

    return score_a, score_b


def pairwise_sentence_ranking(sent_a, sent_b, weight, bias, activation_dtype=None):
    """weight: (1, H) like nn.Linear(hidden, 1).weight; bias: (1,).

    activation_dtype: optionally stream activations as e.g. jnp.bfloat16
    (halves HBM traffic on this bandwidth-bound kernel; slight numerics change
    vs. the f32 PyTorch reference, so it stays opt-in).  Inputs that are
    already bf16 stream as bf16 automatically (the kernel upcasts to f32).

    Returns (score_a, score_b), each (batch, seq, 1) float32."""
    b, s, h = sent_a.shape
    if activation_dtype is not None:
        sent_a = sent_a.astype(activation_dtype)
        sent_b = sent_b.astype(activation_dtype)

    a_flat = sent_a.reshape(b * s, h)
    b_flat = sent_b.reshape(b * s, h)
    w_1h = weight.astype(jnp.float32)                 # keep lane-dense (1, H)
    bias_2d = bias.reshape(1, 1).astype(jnp.float32)  # SMEM scalar

    score_a, score_b = _phi_pair(a_flat, b_flat, w_1h, bias_2d)
    return score_a.reshape(b, s, 1), score_b.reshape(b, s, 1)


if __name__ == "__main__":
    key = jax.random.PRNGKey(0)
    k_a, k_b, k_w, k_bias = jax.random.split(key, 4)

    batch, seq, hidden = 2, 8, 32
    sent_a = jax.random.normal(k_a, (batch, seq, hidden), dtype=jnp.float32)
    sent_b = jax.random.normal(k_b, (batch, seq, hidden), dtype=jnp.float32)

    # Deterministic parameter init (matches nn.Linear(hidden, 1) shapes).
    bound = 1.0 / (hidden ** 0.5)
    weight = jax.random.uniform(k_w, (1, hidden), jnp.float32, -bound, bound)
    bias = jax.random.uniform(k_bias, (1,), jnp.float32, -bound, bound)

    score_a, score_b = jax.jit(pairwise_sentence_ranking)(sent_a, sent_b, weight, bias)
    jax.block_until_ready((score_a, score_b))

    # Sanity check against plain-JAX reference (eval-mode dropout == identity).
    ref_a = sent_a @ weight.T + bias
    ref_b = sent_b @ weight.T + bias
    assert score_a.shape == (batch, seq, 1) and score_b.shape == (batch, seq, 1)
    assert jnp.allclose(score_a, ref_a, atol=1e-5)
    assert jnp.allclose(score_b, ref_b, atol=1e-5)

    print("KERNEL_OK")
</pallas_src>

<mosaic_0001>
module attributes {stable_mosaic.version = 11 : i64} {
  func.func @_phi_pair_kernel(%arg0: i32, %arg1: memref<1x32xf32, #tpu.memory_space<vmem>>, %arg2: memref<1x1xf32, #tpu.memory_space<smem>>, %arg3: memref<16x32xf32, #tpu.memory_space<vmem>>, %arg4: memref<16x32xf32, #tpu.memory_space<vmem>>, %arg5: memref<16x1xf32, #tpu.memory_space<vmem>>, %arg6: memref<16x1xf32, #tpu.memory_space<vmem>>) attributes {dimension_semantics = [#tpu.dimension_semantics<parallel>], iteration_bounds = array<i64: 1>, scalar_prefetch = 0 : i64, scratch_operands = 0 : i64, tpu.core_type = #tpu.core_type<tc>, window_params = [{pipeline_mode = #tpu.pipeline_mode<synchronous>, transform_indices = @transform_0, window_bounds = array<i64: 1, 32>}, {transform_indices = @transform_1, window_bounds = array<i64: 1, 1>}, {transform_indices = @transform_2, window_bounds = array<i64: 16, 32>}, {transform_indices = @transform_3, window_bounds = array<i64: 16, 32>}, {transform_indices = @transform_4, window_bounds = array<i64: 16, 1>}, {transform_indices = @transform_5, window_bounds = array<i64: 16, 1>}]} {
    %c0 = arith.constant 0 : index
    %c0_0 = arith.constant 0 : index
    %0 = vector.load %arg1[%c0, %c0_0] : memref<1x32xf32, #tpu.memory_space<vmem>>, vector<1x32xf32>
    %c0_1 = arith.constant 0 : index
    %c0_2 = arith.constant 0 : index
    %1 = memref.load %arg2[%c0_1, %c0_2] : memref<1x1xf32, #tpu.memory_space<smem>>
    %c0_3 = arith.constant 0 : index
    %c0_4 = arith.constant 0 : index
    %2 = vector.load %arg3[%c0_3, %c0_4] : memref<16x32xf32, #tpu.memory_space<vmem>>, vector<16x32xf32>
    %c0_5 = arith.constant 0 : index
    %c0_6 = arith.constant 0 : index
    %3 = vector.load %arg4[%c0_5, %c0_6] : memref<16x32xf32, #tpu.memory_space<vmem>>, vector<16x32xf32>
    %4 = vector.broadcast %0 : vector<1x32xf32> to vector<16x32xf32>
    %5 = arith.mulf %2, %4 : vector<16x32xf32>
    %cst = arith.constant dense<0.000000e+00> : vector<16xf32>
    %6 = vector.multi_reduction <add>, %5, %cst [1] : vector<16x32xf32> to vector<16xf32>
    %7 = vector.shape_cast %6 : vector<16xf32> to vector<16x1xf32>
    %8 = vector.broadcast %1 : f32 to vector<16x1xf32>
    %9 = arith.addf %7, %8 : vector<16x1xf32>
    %c0_7 = arith.constant 0 : index
    %c0_8 = arith.constant 0 : index
    %10 = vector.load %arg5[%c0_7, %c0_8] : memref<16x1xf32, #tpu.memory_space<vmem>>, vector<16x1xf32>
    tpu.vector_store %arg5[%c0_7, %c0_8], %9 {strides = array<i32>} : memref<16x1xf32, #tpu.memory_space<vmem>>, vector<16x1xf32>,
    %11 = vector.broadcast %0 : vector<1x32xf32> to vector<16x32xf32>
    %12 = arith.mulf %3, %11 : vector<16x32xf32>
    %cst_9 = arith.constant dense<0.000000e+00> : vector<16xf32>
    %13 = vector.multi_reduction <add>, %12, %cst_9 [1] : vector<16x32xf32> to vector<16xf32>
    %14 = vector.shape_cast %13 : vector<16xf32> to vector<16x1xf32>
    %15 = vector.broadcast %1 : f32 to vector<16x1xf32>
    %16 = arith.addf %14, %15 : vector<16x1xf32>
    %c0_10 = arith.constant 0 : index
    %c0_11 = arith.constant 0 : index
    %17 = vector.load %arg6[%c0_10, %c0_11] : memref<16x1xf32, #tpu.memory_space<vmem>>, vector<16x1xf32>
    tpu.vector_store %arg6[%c0_10, %c0_11], %16 {strides = array<i32>} : memref<16x1xf32, #tpu.memory_space<vmem>>, vector<16x1xf32>,
    return
  }
  func.func @transform_0(%arg0: i32) -> (i32, i32) {
    %c0_i32 = arith.constant 0 : i32
    %c0_i32_0 = arith.constant 0 : i32
    %c0_i32_1 = arith.constant 0 : i32
    return %c0_i32, %c0_i32_0 : i32, i32
  }
  func.func @transform_1(%arg0: i32) -> (i32, i32) {
    %c0_i32 = arith.constant 0 : i32
    %c0_i32_0 = arith.constant 0 : i32
    %c0_i32_1 = arith.constant 0 : i32
    return %c0_i32, %c0_i32_0 : i32, i32
  }
  func.func @transform_2(%arg0: i32) -> (i32, i32) {
    %c0_i32 = arith.constant 0 : i32
    %c0_i32_0 = arith.constant 0 : i32
    return %arg0, %c0_i32 : i32, i32
  }
  func.func @transform_3(%arg0: i32) -> (i32, i32) {
    %c0_i32 = arith.constant 0 : i32
    %c0_i32_0 = arith.constant 0 : i32
    return %arg0, %c0_i32 : i32, i32
  }
  func.func @transform_4(%arg0: i32) -> (i32, i32) {
    %c0_i32 = arith.constant 0 : i32
    %c0_i32_0 = arith.constant 0 : i32
    return %arg0, %c0_i32 : i32, i32
  }
  func.func @transform_5(%arg0: i32) -> (i32, i32) {
    %c0_i32 = arith.constant 0 : i32
    %c0_i32_0 = arith.constant 0 : i32
    return %arg0, %c0_i32 : i32, i32
  }
}

</mosaic_0001>

<bundles_post_ra>
// kernel: pairwise_sentence_ranking.1
= control target key start
LH: loop header
LB: loop body
LE: loop exit
PB: predicated region body
PF: predicated region fallthrough
CT: control target
= control target key end

     0   :  { %12 = vsyncpa [#allocation4], 0  ;;  %s110_s18 = smov [#allocation3]   ;;  %s179_s0 = inlined_call_operand.vmem [shape: f32[1,32], index: 0, kind: input, shape index: {}]   ;;  %s180_s1 = inlined_call_operand.<no memory space> [shape: f32[1,1], index: 1, kind: input, shape index: {}]   ;;  %s181_s2 = inlined_call_operand.hbm [shape: f32[16,32], index: 2, kind: input, shape index: {}]   ;;  %s182_s3 = inlined_call_operand.vmem [shape: f32[16,32], index: 3, kind: input, shape index: {}]   ;;  %s183_s4 = inlined_call_operand.vmem [shape: f32[16,1], index: 4, kind: output, shape index: {0}]   ;;  %s184_s5 = inlined_call_operand.vmem [shape: f32[16,1], index: 5, kind: output, shape index: {1}]  }
   0x1   :  { %s22_s19 = sshll.u32 %s110_s18, 4  ;;  %s86_s22 = scalar_lea.hbm %s181_s2, 256  ;;  %s23_s19 = int_to_ptr.vmem [resolvable:$true] %s22_s19 }
   0x2   :  { %p87_p0 = scmp.ne.s32.totalorder %s181_s2, %s86_s22  ;;  %p90_p1 = scmp.lt.u32.totalorder %s86_s22, %s181_s2 }
   0x4   :  { %p92_p2 = pnand %p90_p1, %p87_p0 }
   0x6   :  { %95 = shalt.err (!%p92_p2)
}
   0x7   :  { %s96_s27 = scalar_lea.vmem %s23_s19, 256  ;;  %p101_p4 = scmp.lt.s32.totalorder %s23_s19, %s23_s19 }
   0x8   :  { %p97_p3 = scmp.ne.s32.totalorder %s23_s19, %s96_s27  ;;  %p102_p5 = scmp.lt.s32.totalorder %s96_s27, %s96_s27 }
   0xa   :  { %p103_p6 = por %p102_p5, %p101_p4 }
   0xc   :  { %p104_p7 = pnand %p103_p6, %p97_p3 }
   0xe   :  { %107 = shalt.err (!%p104_p7)
}
   0xf   :  { %s111_s28 = smov 128   ;;  %s112_s29 = smov 8  }
  0x10   :  { %28 = dma.hbm_to_vmem [thread:$0]  %s181_s2, 256, %s23_s19, [#allocation4], %s111_s28, %s111_s28, %s112_s29  }
  0x11   :  { %108 = dma.done.wait [#allocation4], 256  }
  0x12   :  { %109 = vsyncadd [#allocation4], 4294967040  ;;  %v82_v0 = vld [vmem:[%s179_s0] ss:$0 sm:$0xff]  ;;  %vm48_vm0 = vcmask 261120   ;;  %v39_v5 = vld [vmem:[%s182_s3 + $0x8] sm:$0xff]  ;;  %v55_v13 = vstv %s180_s1 }
  0x13   :  { %v38_v1 = vld [vmem:[%s182_s3] sm:$0xff]  ;;  %v37_v6 = vld [vmem:[#allocation3 + $0x8] sm:$0xff]  ;;  %v62_v7 = vmul.f32 %v82_v0, %v39_v5  ;;  %vm58_vm1 = vcmask 7168  }
  0x14   :  { %v36_v2 = vld [vmem:[#allocation3] sm:$0xff]  ;;  %v61_v3 = vmul.f32 %v82_v0, %v38_v1  ;;  %v47_v8 = vmul.f32 %v82_v0, %v37_v6 }
  0x15   :  { %v46_v4 = vmul.f32 %v82_v0, %v36_v2  ;;  %v66_v11 = vsel %vm48_vm0, %v62_v7, 0.0 }
  0x16   :  { %v63_v9 = vsel %vm48_vm0, %v61_v3, 0.0  ;;  %v52_v12 = vsel %vm48_vm0, %v47_v8, 0.0 }
  0x17   :  { %v49_v10 = vsel %vm48_vm0, %v46_v4, 0.0  ;;  %64 = vadd.xlane.f32.xlu1 %v63_v9 }
  0x18   :  { %50 = vadd.xlane.f32.xlu0 %v49_v10 }
  0x1b   :  { %67 = vadd.xlane.f32.xlu1 %v66_v11 }
  0x1c   :  { %53 = vadd.xlane.f32.xlu0 %v52_v12 }
  0xa4   :  { %v65_v14 = vpop.xlane.xlu1 %64 }
  0xa5   :  { %v51_v15 = vpop.xlane.xlu0 %50  ;;  %v69_v16 = vadd.f32 %v65_v14, %v55_v13 }
  0xa6   :  { %v56_v17 = vadd.f32 %v55_v13, %v51_v15 }
  0xa7   :  { %71 = vst.msk [vmem:[%s184_s5] sm:$0xff] %vm58_vm1, %v69_v16 }
  0xa8   :  { %59 = vst.msk [vmem:[%s183_s4] sm:$0xff] %vm58_vm1, %v56_v17  ;;  %v68_v18 = vpop.xlane.xlu1 %67 }
  0xa9   :  { %v54_v19 = vpop.xlane.xlu0 %53  ;;  %v70_v20 = vadd.f32 %v68_v18, %v55_v13 }
  0xaa   :  { %v57_v21 = vadd.f32 %v55_v13, %v54_v19 }
  0xab   :  { %72 = vst.msk [vmem:[%s184_s5 + $0x8] sm:$0xff] %vm58_vm1, %v70_v20 }
  0xac   :  { %60 = vst.msk [vmem:[%s183_s4 + $0x8] sm:$0xff] %vm58_vm1, %v57_v21 }
  0xad   :  { %81 = vsyncpa [#allocation4], 1 }

</bundles_post_ra>
